<compile_context>
chip_gen: v7x
topology: tpu7x:2x2x1
jax: 0.10.0
libtpu: 0.0.40
codegen_flags: <defaults>
</compile_context>

<pallas_src>
import functools
import math

import jax
import jax.numpy as jnp
from jax import lax
from jax.experimental import pallas as pl
from jax.experimental.pallas import tpu as pltpu


def _mha_kernel(x_ref, k_ref, wq_ref, bq_ref, wo_ref, bo_ref, *refs,
                h, d_k, scale, with_attn_w):
    if with_attn_w:
        out_ref, attn_w_ref, q_scr, ctx_scr = refs
    else:
        out_ref, q_scr, ctx_scr = refs
        attn_w_ref = None

    f32 = jnp.float32
    bf16 = jnp.bfloat16

    x = x_ref[0]                                   # (Tq, d) bf16 query tile
    Tq = x.shape[0]
    S = k_ref.shape[2]

    # Q projection (nn.Linear with pre-transposed weight): q = x @ Wq^T + bq.
    q = jnp.dot(x, wq_ref[...], preferred_element_type=f32) + bq_ref[...]
    # Fold 1/sqrt(d_k) into q once (after bias; same scores as scaling q@k^T).
    qb = (q * scale).astype(bf16)

    # Split Q head-major into VMEM scratch: per-head MXU operands become
    # tile-aligned ref reads (the lane relayout happens once, at write time).
    for i in range(h):
        q_scr[i] = qb[:, i * d_k:(i + 1) * d_k]

    if with_attn_w:
        w_sum = jnp.zeros((Tq, S), f32)            # head-summed attention weights

    for i in range(h):
        kh = k_ref[0, i]                           # (S, d_k) bf16; V == K (ref uses wk for v)
        # q @ k^T without a materialized transpose: contract the last dims.
        s = lax.dot_general(q_scr[i], kh, (((1,), (1,)), ((), ())),
                            preferred_element_type=f32)            # (Tq, S) f32
        # TODO(synk): mask path (masked_fill(mask==0, -inf)) would be a jnp.where here.
        s = s - jnp.max(s, axis=-1, keepdims=True)
        e = jnp.exp(s)                             # f32 exp (safe on v5e: no bf16 EUP)
        attn = e * pl.reciprocal(jnp.sum(e, axis=-1, keepdims=True), approx=True)
        if with_attn_w:
            w_sum = w_sum + attn
        ctx = jnp.dot(attn.astype(bf16), kh, preferred_element_type=f32)   # (Tq, d_k)
        # Stash ctx_h at its static column slot; Wo is applied once after the loop.
        ctx_scr[:, i * d_k:(i + 1) * d_k] = ctx.astype(bf16)

    # Fused output projection: one (Tq, d) @ (d, d) matmul (contraction depth d).
    out = jnp.dot(ctx_scr[...], wo_ref[...], preferred_element_type=f32) + bo_ref[...]
    out_ref[0] = out.astype(out_ref.dtype)         # dropout(0.0) -> identity
    if with_attn_w:
        attn_w_ref[0] = w_sum.astype(attn_w_ref.dtype)


def _derive_vmem_limit(*, q_block, S, d, h, d_k, with_attn_w, attn_bytes):
    """Estimate VMEM use from block shapes (double-buffered) + scratch + temps."""
    bf, f32 = 2, 4
    db = 2                                          # default pipeline double-buffering
    blocks = 0
    blocks += db * q_block * d * bf                 # x tile
    blocks += db * h * S * d_k * bf                 # K (== V), full context per batch
    blocks += db * 2 * d * d * bf                   # Wq^T, Wo^T (grid-invariant)
    blocks += db * 2 * d * f32                      # bq, bo
    blocks += db * q_block * d * f32                # out tile
    if with_attn_w:
        blocks += db * q_block * S * attn_bytes     # attention-weight tile
    scratch = h * q_block * d_k * bf + q_block * d * bf
    temps = q_block * d * f32 + 3 * q_block * S * f32   # q f32, scores/exp/attn
    if with_attn_w:
        temps += q_block * S * f32                  # w_sum
    est = blocks + scratch + temps
    return max(int(est * 1.5) + (4 << 20), 32 << 20)


def multi_head_attention(x, z, params, *, h, q_block=None,
                         return_attn_weights=True, attn_weights_dtype=jnp.float32):
    """Pallas MHA. x, z: (B, S, d) f32. Returns (output, attn_weight_sum) or just output."""
    B, S, d = x.shape
    assert d % h == 0
    d_k = d // h
    if q_block is None:
        q_block = S if S <= 256 else 256
    assert S % q_block == 0
    # bf16 packs 16 rows per vreg: require 16-row multiples unless the tile is full S.
    assert (q_block % 16 == 0) or (q_block == S)

    wq, bq, wk, bk, wo, bo = params
    cdt = jnp.bfloat16
    f32 = jnp.float32

    # --- wrapper-side layout plumbing & K hoist (computed ONCE per batch) ---
    # Reference forward uses wk for BOTH k and v -> V == K; pass it head-major.
    k = jnp.einsum("bsd,ed->bse", z.astype(f32), wk.astype(f32),
                   preferred_element_type=f32) + bk.astype(f32)
    k_heads = k.reshape(B, S, h, d_k).transpose(0, 2, 1, 3).astype(cdt)   # (B, h, S, d_k)

    wq_t = jnp.asarray(wq.T, cdt)
    wo_t = jnp.asarray(wo.T, cdt)
    x_c = x.astype(cdt)
    bq2 = bq.reshape(1, d).astype(f32)
    bo2 = bo.reshape(1, d).astype(f32)

    grid = (B, S // q_block)
    x_spec = pl.BlockSpec((1, q_block, d), lambda b, t: (b, t, 0))
    k_spec = pl.BlockSpec((1, h, S, d_k), lambda b, t: (b, 0, 0, 0))   # full context, per batch
    w_spec = pl.BlockSpec((d, d), lambda b, t: (0, 0))                 # grid-invariant
    b_spec = pl.BlockSpec((1, d), lambda b, t: (0, 0))
    out_spec = pl.BlockSpec((1, q_block, d), lambda b, t: (b, t, 0))

    out_specs = [out_spec]
    out_shapes = [jax.ShapeDtypeStruct((B, S, d), jnp.float32)]
    if return_attn_weights:
        out_specs.append(pl.BlockSpec((1, q_block, S), lambda b, t: (b, t, 0)))
        out_shapes.append(jax.ShapeDtypeStruct((B, S, S), attn_weights_dtype))

    vmem_limit = _derive_vmem_limit(
        q_block=q_block, S=S, d=d, h=h, d_k=d_k,
        with_attn_w=return_attn_weights,
        attn_bytes=jnp.dtype(attn_weights_dtype).itemsize)

    kernel = functools.partial(_mha_kernel, h=h, d_k=d_k, scale=d_k ** (-0.5),
                               with_attn_w=return_attn_weights)
    res = pl.pallas_call(
        kernel,
        grid=grid,
        in_specs=[x_spec, k_spec, w_spec, b_spec, w_spec, b_spec],
        out_specs=tuple(out_specs),
        out_shape=tuple(out_shapes),
        scratch_shapes=[pltpu.VMEM((h, q_block, d_k), cdt),   # head-major Q
                        pltpu.VMEM((q_block, d), cdt)],       # concatenated ctx for fused Wo
        compiler_params=pltpu.CompilerParams(
            # No cross-step accumulation -> both axes independent (megacore/v7x friendly).
            dimension_semantics=("parallel", "parallel"),
            vmem_limit_bytes=vmem_limit,
        ),
    )(x_c, k_heads, wq_t, bq2, wo_t, bo2)

    if return_attn_weights:
        return res[0], res[1]
    return res[0]


def _reference(x, z, params, h):
    """Pure-JAX f32 reference mirroring the PyTorch forward (sanity check)."""
    B, S, d = x.shape
    d_k = d // h
    wq, bq, wk, bk, wo, bo = params
    q = x @ wq.T + bq
    k = z @ wk.T + bk
    v = z @ wk.T + bk          # forward uses wk for v
    def split(t):
        return t.reshape(B, S, h, d_k).transpose(0, 2, 1, 3)   # (B, h, S, d_k)
    q, k, v = split(q), split(k), split(v)
    scores = jnp.einsum("bhqd,bhkd->bhqk", q, k) * d_k ** (-0.5)
    attn = jax.nn.softmax(scores, axis=-1)
    atn = jnp.einsum("bhqk,bhkd->bhqd", attn, v)
    concat = atn.transpose(0, 2, 1, 3).reshape(B, S, d)
    out = concat @ wo.T + bo
    return out, jnp.sum(attn, axis=1)


if __name__ == "__main__":
    # NOTE: perf tuning must happen at production shapes (d multiple of 128, S >= 512);
    # these small shapes are only a correctness harness.
    B, S, d, h = 2, 32, 32, 4   # S=32 with q_block=16 exercises the query-tile grid axis

    key = jax.random.PRNGKey(0)
    ks = jax.random.split(key, 10)
    scale = 1.0 / math.sqrt(d)
    x = jax.random.normal(ks[0], (B, S, d), jnp.float32)
    z = jax.random.normal(ks[1], (B, S, d), jnp.float32)
    wq = jax.random.normal(ks[2], (d, d), jnp.float32) * scale
    bq = jax.random.normal(ks[3], (d,), jnp.float32) * 0.1
    wk = jax.random.normal(ks[4], (d, d), jnp.float32) * scale
    bk = jax.random.normal(ks[5], (d,), jnp.float32) * 0.1
    # wv/bv exist in the module but are unused by the reference forward (it uses wk for v).
    wo = jax.random.normal(ks[8], (d, d), jnp.float32) * scale
    bo = jax.random.normal(ks[9], (d,), jnp.float32) * 0.1
    params = (wq, bq, wk, bk, wo, bo)

    out, attn_w = multi_head_attention(x, z, params, h=h, q_block=16)
    jax.block_until_ready((out, attn_w))

    ref_out, ref_attn_w = _reference(x, z, params, h)
    assert out.shape == (B, S, d) and attn_w.shape == (B, S, S)
    # Tolerances loosened vs. a pure-f32 run because matmuls use bf16 operands
    # (f32 accumulation) and softmax uses the approx EUP reciprocal.
    assert jnp.allclose(out, ref_out, atol=5e-2, rtol=5e-2), (
        float(jnp.max(jnp.abs(out - ref_out))))
    assert jnp.allclose(attn_w, ref_attn_w, atol=5e-2, rtol=5e-2), (
        float(jnp.max(jnp.abs(attn_w - ref_attn_w))))

    print("KERNEL_OK")
</pallas_src>

<mosaic_0001>
module attributes {stable_mosaic.version = 11 : i64} {
  func.func @_mha_kernel(%arg0: i32, %arg1: i32, %arg2: memref<1x16x32xbf16, #tpu.memory_space<vmem>>, %arg3: memref<1x4x32x8xbf16, #tpu.memory_space<vmem>>, %arg4: memref<32x32xbf16, #tpu.memory_space<vmem>>, %arg5: memref<1x32xf32, #tpu.memory_space<vmem>>, %arg6: memref<32x32xbf16, #tpu.memory_space<vmem>>, %arg7: memref<1x32xf32, #tpu.memory_space<vmem>>, %arg8: memref<1x16x32xf32, #tpu.memory_space<vmem>>, %arg9: memref<1x16x32xf32, #tpu.memory_space<vmem>>, %arg10: memref<4x16x8xbf16, #tpu.memory_space<vmem>>, %arg11: memref<16x32xbf16, #tpu.memory_space<vmem>>) attributes {dimension_semantics = [#tpu.dimension_semantics<parallel>, #tpu.dimension_semantics<parallel>], iteration_bounds = array<i64: 2, 2>, scalar_prefetch = 0 : i64, scratch_operands = 2 : i64, tpu.core_type = #tpu.core_type<tc>, window_params = [{transform_indices = @transform_0, window_bounds = array<i64: 1, 16, 32>}, {transform_indices = @transform_1, window_bounds = array<i64: 1, 4, 32, 8>}, {pipeline_mode = #tpu.pipeline_mode<synchronous>, transform_indices = @transform_2, window_bounds = array<i64: 32, 32>}, {pipeline_mode = #tpu.pipeline_mode<synchronous>, transform_indices = @transform_3, window_bounds = array<i64: 1, 32>}, {pipeline_mode = #tpu.pipeline_mode<synchronous>, transform_indices = @transform_4, window_bounds = array<i64: 32, 32>}, {pipeline_mode = #tpu.pipeline_mode<synchronous>, transform_indices = @transform_5, window_bounds = array<i64: 1, 32>}, {transform_indices = @transform_6, window_bounds = array<i64: 1, 16, 32>}, {transform_indices = @transform_7, window_bounds = array<i64: 1, 16, 32>}]} {
    %c0 = arith.constant 0 : index
    %c0_0 = arith.constant 0 : index
    %c0_1 = arith.constant 0 : index
    %0 = vector.load %arg2[%c0, %c0_0, %c0_1] : memref<1x16x32xbf16, #tpu.memory_space<vmem>>, vector<1x16x32xbf16>
    %1 = vector.shape_cast %0 : vector<1x16x32xbf16> to vector<16x32xbf16>
    %c0_2 = arith.constant 0 : index
    %c0_3 = arith.constant 0 : index
    %2 = vector.load %arg4[%c0_2, %c0_3] : memref<32x32xbf16, #tpu.memory_space<vmem>>, vector<32x32xbf16>
    %cst = arith.constant dense<0.000000e+00> : vector<16x32xf32>
    %3 = tpu.matmul %1, %2, %cst {dimension_numbers = #tpu.dot_dimension_numbers<[1], [0], [0], [1], [0, 0, 1, 1], [], []>} : vector<16x32xbf16>, vector<32x32xbf16>, vector<16x32xf32> -> vector<16x32xf32>
    %c0_4 = arith.constant 0 : index
    %c0_5 = arith.constant 0 : index
    %4 = vector.load %arg5[%c0_4, %c0_5] : memref<1x32xf32, #tpu.memory_space<vmem>>, vector<1x32xf32>
    %5 = vector.broadcast %4 : vector<1x32xf32> to vector<16x32xf32>
    %6 = arith.addf %3, %5 : vector<16x32xf32>
    %cst_6 = arith.constant 0.353553385 : f32
    %7 = vector.broadcast %cst_6 : f32 to vector<16x32xf32>
    %8 = arith.mulf %6, %7 : vector<16x32xf32>
    %9 = arith.truncf %8 : vector<16x32xf32> to vector<16x32xbf16>
    %10 = vector.extract_strided_slice %9 {offsets = [0, 0], sizes = [16, 8], strides = [1, 1]} : vector<16x32xbf16> to vector<16x8xbf16>
    %c0_7 = arith.constant 0 : index
    %c0_8 = arith.constant 0 : index
    %c0_9 = arith.constant 0 : index
    %11 = vector.load %arg10[%c0_7, %c0_8, %c0_9] : memref<4x16x8xbf16, #tpu.memory_space<vmem>>, vector<1x16x8xbf16>
    %12 = vector.shape_cast %11 : vector<1x16x8xbf16> to vector<16x8xbf16>
    %13 = vector.shape_cast %10 : vector<16x8xbf16> to vector<1x16x8xbf16>
    tpu.vector_store %arg10[%c0_7, %c0_8, %c0_9], %13 {strides = array<i32>} : memref<4x16x8xbf16, #tpu.memory_space<vmem>>, vector<1x16x8xbf16>,
    %14 = vector.extract_strided_slice %9 {offsets = [0, 8], sizes = [16, 8], strides = [1, 1]} : vector<16x32xbf16> to vector<16x8xbf16>
    %c1 = arith.constant 1 : index
    %c0_10 = arith.constant 0 : index
    %c0_11 = arith.constant 0 : index
    %15 = vector.load %arg10[%c1, %c0_10, %c0_11] : memref<4x16x8xbf16, #tpu.memory_space<vmem>>, vector<1x16x8xbf16>
    %16 = vector.shape_cast %15 : vector<1x16x8xbf16> to vector<16x8xbf16>
    %17 = vector.shape_cast %14 : vector<16x8xbf16> to vector<1x16x8xbf16>
    tpu.vector_store %arg10[%c1, %c0_10, %c0_11], %17 {strides = array<i32>} : memref<4x16x8xbf16, #tpu.memory_space<vmem>>, vector<1x16x8xbf16>,
    %18 = vector.extract_strided_slice %9 {offsets = [0, 16], sizes = [16, 8], strides = [1, 1]} : vector<16x32xbf16> to vector<16x8xbf16>
    %c2 = arith.constant 2 : index
    %c0_12 = arith.constant 0 : index
    %c0_13 = arith.constant 0 : index
    %19 = vector.load %arg10[%c2, %c0_12, %c0_13] : memref<4x16x8xbf16, #tpu.memory_space<vmem>>, vector<1x16x8xbf16>
    %20 = vector.shape_cast %19 : vector<1x16x8xbf16> to vector<16x8xbf16>
    %21 = vector.shape_cast %18 : vector<16x8xbf16> to vector<1x16x8xbf16>
    tpu.vector_store %arg10[%c2, %c0_12, %c0_13], %21 {strides = array<i32>} : memref<4x16x8xbf16, #tpu.memory_space<vmem>>, vector<1x16x8xbf16>,
    %22 = vector.extract_strided_slice %9 {offsets = [0, 24], sizes = [16, 8], strides = [1, 1]} : vector<16x32xbf16> to vector<16x8xbf16>
    %c3 = arith.constant 3 : index
    %c0_14 = arith.constant 0 : index
    %c0_15 = arith.constant 0 : index
    %23 = vector.load %arg10[%c3, %c0_14, %c0_15] : memref<4x16x8xbf16, #tpu.memory_space<vmem>>, vector<1x16x8xbf16>
    %24 = vector.shape_cast %23 : vector<1x16x8xbf16> to vector<16x8xbf16>
    %25 = vector.shape_cast %22 : vector<16x8xbf16> to vector<1x16x8xbf16>
    tpu.vector_store %arg10[%c3, %c0_14, %c0_15], %25 {strides = array<i32>} : memref<4x16x8xbf16, #tpu.memory_space<vmem>>, vector<1x16x8xbf16>,
    %cst_16 = arith.constant 0.000000e+00 : f32
    %26 = vector.broadcast %cst_16 : f32 to vector<16x32xf32>
    %c0_17 = arith.constant 0 : index
    %c0_18 = arith.constant 0 : index
    %c0_19 = arith.constant 0 : index
    %c0_20 = arith.constant 0 : index
    %27 = vector.load %arg3[%c0_17, %c0_18, %c0_19, %c0_20] : memref<1x4x32x8xbf16, #tpu.memory_space<vmem>>, vector<1x1x32x8xbf16>
    %28 = vector.shape_cast %27 : vector<1x1x32x8xbf16> to vector<32x8xbf16>
    %c0_21 = arith.constant 0 : index
    %c0_22 = arith.constant 0 : index
    %c0_23 = arith.constant 0 : index
    %29 = vector.load %arg10[%c0_21, %c0_22, %c0_23] : memref<4x16x8xbf16, #tpu.memory_space<vmem>>, vector<1x16x8xbf16>
    %30 = vector.shape_cast %29 : vector<1x16x8xbf16> to vector<16x8xbf16>
    %cst_24 = arith.constant dense<0.000000e+00> : vector<16x32xf32>
    %31 = tpu.matmul %30, %28, %cst_24 {dimension_numbers = #tpu.dot_dimension_numbers<[1], [1], [0], [0], [0, 0, 1, 0], [], []>} : vector<16x8xbf16>, vector<32x8xbf16>, vector<16x32xf32> -> vector<16x32xf32>
    %cst_25 = arith.constant dense<0xFF800000> : vector<16xf32>
    %32 = vector.multi_reduction <maximumf>, %31, %cst_25 [1] : vector<16x32xf32> to vector<16xf32>
    %33 = vector.shape_cast %32 : vector<16xf32> to vector<16x1xf32>
    %34 = vector.broadcast %33 : vector<16x1xf32> to vector<16x32xf32>
    %35 = arith.subf %31, %34 : vector<16x32xf32>
    %36 = math.exp %35 : vector<16x32xf32>
    %cst_26 = arith.constant dense<0.000000e+00> : vector<16xf32>
    %37 = vector.multi_reduction <add>, %36, %cst_26 [1] : vector<16x32xf32> to vector<16xf32>
    %38 = vector.shape_cast %37 : vector<16xf32> to vector<16x1xf32>
    %39 = tpu.reciprocal %38 {approx = true} : vector<16x1xf32> -> vector<16x1xf32>
    %40 = vector.broadcast %39 : vector<16x1xf32> to vector<16x32xf32>
    %41 = arith.mulf %36, %40 : vector<16x32xf32>
    %42 = arith.addf %26, %41 : vector<16x32xf32>
    %43 = arith.truncf %41 : vector<16x32xf32> to vector<16x32xbf16>
    %cst_27 = arith.constant dense<0.000000e+00> : vector<16x8xf32>
    %44 = tpu.matmul %43, %28, %cst_27 {dimension_numbers = #tpu.dot_dimension_numbers<[1], [0], [0], [1], [0, 0, 1, 1], [], []>} : vector<16x32xbf16>, vector<32x8xbf16>, vector<16x8xf32> -> vector<16x8xf32>
    %45 = arith.truncf %44 : vector<16x8xf32> to vector<16x8xbf16>
    %c0_28 = arith.constant 0 : index
    %c0_29 = arith.constant 0 : index
    %46 = vector.load %arg11[%c0_28, %c0_29] : memref<16x32xbf16, #tpu.memory_space<vmem>>, vector<16x8xbf16>
    tpu.vector_store %arg11[%c0_28, %c0_29], %45 {strides = array<i32>} : memref<16x32xbf16, #tpu.memory_space<vmem>>, vector<16x8xbf16>,
    %c0_30 = arith.constant 0 : index
    %c1_31 = arith.constant 1 : index
    %c0_32 = arith.constant 0 : index
    %c0_33 = arith.constant 0 : index
    %47 = vector.load %arg3[%c0_30, %c1_31, %c0_32, %c0_33] : memref<1x4x32x8xbf16, #tpu.memory_space<vmem>>, vector<1x1x32x8xbf16>
    %48 = vector.shape_cast %47 : vector<1x1x32x8xbf16> to vector<32x8xbf16>
    %c1_34 = arith.constant 1 : index
    %c0_35 = arith.constant 0 : index
    %c0_36 = arith.constant 0 : index
    %49 = vector.load %arg10[%c1_34, %c0_35, %c0_36] : memref<4x16x8xbf16, #tpu.memory_space<vmem>>, vector<1x16x8xbf16>
    %50 = vector.shape_cast %49 : vector<1x16x8xbf16> to vector<16x8xbf16>
    %cst_37 = arith.constant dense<0.000000e+00> : vector<16x32xf32>
    %51 = tpu.matmul %50, %48, %cst_37 {dimension_numbers = #tpu.dot_dimension_numbers<[1], [1], [0], [0], [0, 0, 1, 0], [], []>} : vector<16x8xbf16>, vector<32x8xbf16>, vector<16x32xf32> -> vector<16x32xf32>
    %cst_38 = arith.constant dense<0xFF800000> : vector<16xf32>
    %52 = vector.multi_reduction <maximumf>, %51, %cst_38 [1] : vector<16x32xf32> to vector<16xf32>
    %53 = vector.shape_cast %52 : vector<16xf32> to vector<16x1xf32>
    %54 = vector.broadcast %53 : vector<16x1xf32> to vector<16x32xf32>
    %55 = arith.subf %51, %54 : vector<16x32xf32>
    %56 = math.exp %55 : vector<16x32xf32>
    %cst_39 = arith.constant dense<0.000000e+00> : vector<16xf32>
    %57 = vector.multi_reduction <add>, %56, %cst_39 [1] : vector<16x32xf32> to vector<16xf32>
    %58 = vector.shape_cast %57 : vector<16xf32> to vector<16x1xf32>
    %59 = tpu.reciprocal %58 {approx = true} : vector<16x1xf32> -> vector<16x1xf32>
    %60 = vector.broadcast %59 : vector<16x1xf32> to vector<16x32xf32>
    %61 = arith.mulf %56, %60 : vector<16x32xf32>
    %62 = arith.addf %42, %61 : vector<16x32xf32>
    %63 = arith.truncf %61 : vector<16x32xf32> to vector<16x32xbf16>
    %cst_40 = arith.constant dense<0.000000e+00> : vector<16x8xf32>
    %64 = tpu.matmul %63, %48, %cst_40 {dimension_numbers = #tpu.dot_dimension_numbers<[1], [0], [0], [1], [0, 0, 1, 1], [], []>} : vector<16x32xbf16>, vector<32x8xbf16>, vector<16x8xf32> -> vector<16x8xf32>
    %65 = arith.truncf %64 : vector<16x8xf32> to vector<16x8xbf16>
    %c0_41 = arith.constant 0 : index
    %c8 = arith.constant 8 : index
    %66 = vector.load %arg11[%c0_41, %c8] : memref<16x32xbf16, #tpu.memory_space<vmem>>, vector<16x8xbf16>
    tpu.vector_store %arg11[%c0_41, %c8], %65 {strides = array<i32>} : memref<16x32xbf16, #tpu.memory_space<vmem>>, vector<16x8xbf16>,
    %c0_42 = arith.constant 0 : index
    %c2_43 = arith.constant 2 : index
    %c0_44 = arith.constant 0 : index
    %c0_45 = arith.constant 0 : index
    %67 = vector.load %arg3[%c0_42, %c2_43, %c0_44, %c0_45] : memref<1x4x32x8xbf16, #tpu.memory_space<vmem>>, vector<1x1x32x8xbf16>
    %68 = vector.shape_cast %67 : vector<1x1x32x8xbf16> to vector<32x8xbf16>
    %c2_46 = arith.constant 2 : index
    %c0_47 = arith.constant 0 : index
    %c0_48 = arith.constant 0 : index
    %69 = vector.load %arg10[%c2_46, %c0_47, %c0_48] : memref<4x16x8xbf16, #tpu.memory_space<vmem>>, vector<1x16x8xbf16>
    %70 = vector.shape_cast %69 : vector<1x16x8xbf16> to vector<16x8xbf16>
    %cst_49 = arith.constant dense<0.000000e+00> : vector<16x32xf32>
    %71 = tpu.matmul %70, %68, %cst_49 {dimension_numbers = #tpu.dot_dimension_numbers<[1], [1], [0], [0], [0, 0, 1, 0], [], []>} : vector<16x8xbf16>, vector<32x8xbf16>, vector<16x32xf32> -> vector<16x32xf32>
    %cst_50 = arith.constant dense<0xFF800000> : vector<16xf32>
    %72 = vector.multi_reduction <maximumf>, %71, %cst_50 [1] : vector<16x32xf32> to vector<16xf32>
    %73 = vector.shape_cast %72 : vector<16xf32> to vector<16x1xf32>
    %74 = vector.broadcast %73 : vector<16x1xf32> to vector<16x32xf32>
    %75 = arith.subf %71, %74 : vector<16x32xf32>
    %76 = math.exp %75 : vector<16x32xf32>
    %cst_51 = arith.constant dense<0.000000e+00> : vector<16xf32>
    %77 = vector.multi_reduction <add>, %76, %cst_51 [1] : vector<16x32xf32> to vector<16xf32>
    %78 = vector.shape_cast %77 : vector<16xf32> to vector<16x1xf32>
    %79 = tpu.reciprocal %78 {approx = true} : vector<16x1xf32> -> vector<16x1xf32>
    %80 = vector.broadcast %79 : vector<16x1xf32> to vector<16x32xf32>
    %81 = arith.mulf %76, %80 : vector<16x32xf32>
    %82 = arith.addf %62, %81 : vector<16x32xf32>
    %83 = arith.truncf %81 : vector<16x32xf32> to vector<16x32xbf16>
    %cst_52 = arith.constant dense<0.000000e+00> : vector<16x8xf32>
    %84 = tpu.matmul %83, %68, %cst_52 {dimension_numbers = #tpu.dot_dimension_numbers<[1], [0], [0], [1], [0, 0, 1, 1], [], []>} : vector<16x32xbf16>, vector<32x8xbf16>, vector<16x8xf32> -> vector<16x8xf32>
    %85 = arith.truncf %84 : vector<16x8xf32> to vector<16x8xbf16>
    %c0_53 = arith.constant 0 : index
    %c16 = arith.constant 16 : index
    %86 = vector.load %arg11[%c0_53, %c16] : memref<16x32xbf16, #tpu.memory_space<vmem>>, vector<16x8xbf16>
    tpu.vector_store %arg11[%c0_53, %c16], %85 {strides = array<i32>} : memref<16x32xbf16, #tpu.memory_space<vmem>>, vector<16x8xbf16>,
    %c0_54 = arith.constant 0 : index
    %c3_55 = arith.constant 3 : index
    %c0_56 = arith.constant 0 : index
    %c0_57 = arith.constant 0 : index
    %87 = vector.load %arg3[%c0_54, %c3_55, %c0_56, %c0_57] : memref<1x4x32x8xbf16, #tpu.memory_space<vmem>>, vector<1x1x32x8xbf16>
    %88 = vector.shape_cast %87 : vector<1x1x32x8xbf16> to vector<32x8xbf16>
    %c3_58 = arith.constant 3 : index
    %c0_59 = arith.constant 0 : index
    %c0_60 = arith.constant 0 : index
    %89 = vector.load %arg10[%c3_58, %c0_59, %c0_60] : memref<4x16x8xbf16, #tpu.memory_space<vmem>>, vector<1x16x8xbf16>
    %90 = vector.shape_cast %89 : vector<1x16x8xbf16> to vector<16x8xbf16>
    %cst_61 = arith.constant dense<0.000000e+00> : vector<16x32xf32>
    %91 = tpu.matmul %90, %88, %cst_61 {dimension_numbers = #tpu.dot_dimension_numbers<[1], [1], [0], [0], [0, 0, 1, 0], [], []>} : vector<16x8xbf16>, vector<32x8xbf16>, vector<16x32xf32> -> vector<16x32xf32>
    %cst_62 = arith.constant dense<0xFF800000> : vector<16xf32>
    %92 = vector.multi_reduction <maximumf>, %91, %cst_62 [1] : vector<16x32xf32> to vector<16xf32>
    %93 = vector.shape_cast %92 : vector<16xf32> to vector<16x1xf32>
    %94 = vector.broadcast %93 : vector<16x1xf32> to vector<16x32xf32>
    %95 = arith.subf %91, %94 : vector<16x32xf32>
    %96 = math.exp %95 : vector<16x32xf32>
    %cst_63 = arith.constant dense<0.000000e+00> : vector<16xf32>
    %97 = vector.multi_reduction <add>, %96, %cst_63 [1] : vector<16x32xf32> to vector<16xf32>
    %98 = vector.shape_cast %97 : vector<16xf32> to vector<16x1xf32>
    %99 = tpu.reciprocal %98 {approx = true} : vector<16x1xf32> -> vector<16x1xf32>
    %100 = vector.broadcast %99 : vector<16x1xf32> to vector<16x32xf32>
    %101 = arith.mulf %96, %100 : vector<16x32xf32>
    %102 = arith.addf %82, %101 : vector<16x32xf32>
    %103 = arith.truncf %101 : vector<16x32xf32> to vector<16x32xbf16>
    %cst_64 = arith.constant dense<0.000000e+00> : vector<16x8xf32>
    %104 = tpu.matmul %103, %88, %cst_64 {dimension_numbers = #tpu.dot_dimension_numbers<[1], [0], [0], [1], [0, 0, 1, 1], [], []>} : vector<16x32xbf16>, vector<32x8xbf16>, vector<16x8xf32> -> vector<16x8xf32>
    %105 = arith.truncf %104 : vector<16x8xf32> to vector<16x8xbf16>
    %c0_65 = arith.constant 0 : index
    %c24 = arith.constant 24 : index
    %106 = vector.load %arg11[%c0_65, %c24] : memref<16x32xbf16, #tpu.memory_space<vmem>>, vector<16x8xbf16>
    tpu.vector_store %arg11[%c0_65, %c24], %105 {strides = array<i32>} : memref<16x32xbf16, #tpu.memory_space<vmem>>, vector<16x8xbf16>,
    %c0_66 = arith.constant 0 : index
    %c0_67 = arith.constant 0 : index
    %107 = vector.load %arg11[%c0_66, %c0_67] : memref<16x32xbf16, #tpu.memory_space<vmem>>, vector<16x32xbf16>
    %c0_68 = arith.constant 0 : index
    %c0_69 = arith.constant 0 : index
    %108 = vector.load %arg6[%c0_68, %c0_69] : memref<32x32xbf16, #tpu.memory_space<vmem>>, vector<32x32xbf16>
    %cst_70 = arith.constant dense<0.000000e+00> : vector<16x32xf32>
    %109 = tpu.matmul %107, %108, %cst_70 {dimension_numbers = #tpu.dot_dimension_numbers<[1], [0], [0], [1], [0, 0, 1, 1], [], []>} : vector<16x32xbf16>, vector<32x32xbf16>, vector<16x32xf32> -> vector<16x32xf32>
    %c0_71 = arith.constant 0 : index
    %c0_72 = arith.constant 0 : index
    %110 = vector.load %arg7[%c0_71, %c0_72] : memref<1x32xf32, #tpu.memory_space<vmem>>, vector<1x32xf32>
    %111 = vector.broadcast %110 : vector<1x32xf32> to vector<16x32xf32>
    %112 = arith.addf %109, %111 : vector<16x32xf32>
    %c0_73 = arith.constant 0 : index
    %c0_74 = arith.constant 0 : index
    %c0_75 = arith.constant 0 : index
    %113 = vector.load %arg8[%c0_73, %c0_74, %c0_75] : memref<1x16x32xf32, #tpu.memory_space<vmem>>, vector<1x16x32xf32>
    %114 = vector.shape_cast %113 : vector<1x16x32xf32> to vector<16x32xf32>
    %115 = vector.shape_cast %112 : vector<16x32xf32> to vector<1x16x32xf32>
    tpu.vector_store %arg8[%c0_73, %c0_74, %c0_75], %115 {strides = array<i32>} : memref<1x16x32xf32, #tpu.memory_space<vmem>>, vector<1x16x32xf32>,
    %c0_76 = arith.constant 0 : index
    %c0_77 = arith.constant 0 : index
    %c0_78 = arith.constant 0 : index
    %116 = vector.load %arg9[%c0_76, %c0_77, %c0_78] : memref<1x16x32xf32, #tpu.memory_space<vmem>>, vector<1x16x32xf32>
    %117 = vector.shape_cast %116 : vector<1x16x32xf32> to vector<16x32xf32>
    %118 = vector.shape_cast %102 : vector<16x32xf32> to vector<1x16x32xf32>
    tpu.vector_store %arg9[%c0_76, %c0_77, %c0_78], %118 {strides = array<i32>} : memref<1x16x32xf32, #tpu.memory_space<vmem>>, vector<1x16x32xf32>,
    return
  }
  func.func @transform_0(%arg0: i32, %arg1: i32) -> (i32, i32, i32) {
    %c0_i32 = arith.constant 0 : i32
    %c0_i32_0 = arith.constant 0 : i32
    return %arg0, %arg1, %c0_i32 : i32, i32, i32
  }
  func.func @transform_1(%arg0: i32, %arg1: i32) -> (i32, i32, i32, i32) {
    %c0_i32 = arith.constant 0 : i32
    %c0_i32_0 = arith.constant 0 : i32
    %c0_i32_1 = arith.constant 0 : i32
    %c0_i32_2 = arith.constant 0 : i32
    return %arg0, %c0_i32, %c0_i32_0, %c0_i32_1 : i32, i32, i32, i32
  }
  func.func @transform_2(%arg0: i32, %arg1: i32) -> (i32, i32) {
    %c0_i32 = arith.constant 0 : i32
    %c0_i32_0 = arith.constant 0 : i32
    %c0_i32_1 = arith.constant 0 : i32
    return %c0_i32, %c0_i32_0 : i32, i32
  }
  func.func @transform_3(%arg0: i32, %arg1: i32) -> (i32, i32) {
    %c0_i32 = arith.constant 0 : i32
    %c0_i32_0 = arith.constant 0 : i32
    %c0_i32_1 = arith.constant 0 : i32
    return %c0_i32, %c0_i32_0 : i32, i32
  }
  func.func @transform_4(%arg0: i32, %arg1: i32) -> (i32, i32) {
    %c0_i32 = arith.constant 0 : i32
    %c0_i32_0 = arith.constant 0 : i32
    %c0_i32_1 = arith.constant 0 : i32
    return %c0_i32, %c0_i32_0 : i32, i32
  }
  func.func @transform_5(%arg0: i32, %arg1: i32) -> (i32, i32) {
    %c0_i32 = arith.constant 0 : i32
    %c0_i32_0 = arith.constant 0 : i32
    %c0_i32_1 = arith.constant 0 : i32
    return %c0_i32, %c0_i32_0 : i32, i32
  }
  func.func @transform_6(%arg0: i32, %arg1: i32) -> (i32, i32, i32) {
    %c0_i32 = arith.constant 0 : i32
    %c0_i32_0 = arith.constant 0 : i32
    return %arg0, %arg1, %c0_i32 : i32, i32, i32
  }
  func.func @transform_7(%arg0: i32, %arg1: i32) -> (i32, i32, i32) {
    %c0_i32 = arith.constant 0 : i32
    %c0_i32_0 = arith.constant 0 : i32
    return %arg0, %arg1, %c0_i32 : i32, i32, i32
  }
}

</mosaic_0001>

<bundles_post_ra>
// kernel: tpu_custom_call.1
= control target key start
LH: loop header
LB: loop body
LE: loop exit
PB: predicated region body
PF: predicated region fallthrough
CT: control target
= control target key end

     0   :  { %s2060_s0 = inlined_call_operand.vmem [shape: bf16[2,32,32], index: 0, kind: input, shape index: {}]   ;;  %s2061_s1 = inlined_call_operand.vmem [shape: bf16[2,4,32,8], index: 1, kind: input, shape index: {}]   ;;  %s2062_s2 = inlined_call_operand.vmem [shape: bf16[32,32], index: 2, kind: input, shape index: {}]   ;;  %s2063_s3 = inlined_call_operand.vmem [shape: f32[1,32], index: 3, kind: input, shape index: {}]   ;;  %s2064_s4 = inlined_call_operand.vmem [shape: bf16[32,32], index: 4, kind: input, shape index: {}]   ;;  %s2065_s5 = inlined_call_operand.vmem [shape: f32[1,32], index: 5, kind: input, shape index: {}]   ;;  %s2066_s6 = inlined_call_operand.hbm [shape: f32[2,32,32], index: 6, kind: output, shape index: {0}]   ;;  %s2067_s7 = inlined_call_operand.hbm [shape: f32[2,32,32], index: 7, kind: output, shape index: {1}]  }
   0x1   :  { %2072 = sst [smem:[#allocation11_spill]] %s2062_s2 }
   0x2   :  { %13 = vsyncpa [#allocation5], 0 }
   0x3   :  { %15 = vsyncpa [#allocation5 + $0x1], 0 }
   0x4   :  { %16 = vsyncpa [#allocation7], 0 }
   0x5   :  { %18 = vsyncpa [#allocation7 + $0x1], 0  ;;  %s1728_s24 = smov 0   ;;  %s1730_s25 = smov 0  }
   0x6   :  { %s1732_s26 = smov 0   ;;  %s1734_s27 = smov 0  }
   0x7   :  { %s1736_s28 = smov 0   ;;  %s1738_s29 = smov 0  }
   0x8   :  { %s1740_s30 = smov 0   ;;  %s1742_s8 = smov 0  }
   0x9 LB: > { %s1249_s9 = sadd.s32 4294967295, %s1675_s8   ;;  %s1250_s10 = sadd.s32 4294967294, %s1675_s8   ;;  %s1675_s8 = sphi %s1742_s8, %s24_s8   ;;  %s1671_s30 = sphi %s1740_s30, %s2087_s30   ;;  %s1667_s29 = sphi %s1738_s29, %s2086_s29   ;;  %s1663_s28 = sphi %s1736_s28, %s2085_s28   ;;  %s1659_s27 = sphi %s1734_s27, %s2084_s27   ;;  %s1655_s26 = sphi %s1732_s26, %s2083_s26   ;;  %s1651_s25 = sphi %s1730_s25, %s2082_s25   ;;  %s1647_s24 = sphi %s1728_s24, %s2081_s24  }
   0xa   : > { %s33_s11 = sadd.s32 1, %s1667_s29  ;;  %s36_s12 = sadd.s32 1, %s1671_s30 }
   0xb   : > { %p34_p0 = scmp.ge.s32.totalorder %s33_s11, 2  ;;  %p193_p1 = scmp.ne.s32.totalorder %s1655_s26, %s1651_s25 }
   0xc   : > { %p194_p2 = scmp.eq.s32.totalorder %s1249_s9, 3  ;;  %p199_p5 = scmp.ne.s32.totalorder %s1651_s25, %s1647_s24 }
   0xd   : > { %s2089_s11 = smov (%p34_p0, %s33_s11), 0  ;;  %s2091_s12 = smov (!%p34_p0, %s36_s12), %s1671_s30 }
   0xe   : > { %s179_s13 = ssub.s32 %s1667_s29, %s2089_s11  ;;  %p1779_p3 = por %p194_p2, %p193_p1 }
   0xf   : > { %p38_p4 = scmp.ge.s32.totalorder %s2091_s12, 2  ;;  %p200_p6 = scmp.eq.s32.totalorder %s1250_s10, 3 }
  0x10   : > { %p1253_p7 = scmp.ge.s32.totalorder %s1675_s8, 1  ;;  %p279_p9 = scmp.lt.s32.totalorder %s1675_s8, 5 }
  0x11   : > { %s2093_s12 = smov (%p38_p4, %s2091_s12), 0  ;;  %p1788_p8 = por %p200_p6, %p199_p5 }
  0x12   : > { %2074 = sst [smem:[#allocation10_spill]] %s2093_s12  ;;  %s178_s16 = ssub.s32 %s1671_s30, %s2093_s12 }
  0x13   : > { %s183_s17 = sadd.s32 1, %s1655_s26  ;;  %s180_s18 = sor.u32 %s179_s13, %s178_s16 }
  0x14   : > { %p280_p10 = pnand %p1253_p7, %p279_p9  ;;  %p181_p11 = scmp.eq.s32.totalorder %s180_s18, 0 }
  0x15   : > { %s2076_s2 = sld [smem:[#allocation11_spill]] (!%p280_p10)  ;;  %v1677_v1 = vmov (!%p280_p10), 0.0   ;;  %vm1678_vm0 = vmmov (!%p280_p10), 0   ;;  %s1810_s9 = sshll.u32 (!%p280_p10), %s1659_s27, 1  ;;  %vm373_vm1 = vcmask (!%p280_p10), 261120   ;;  %vm421_vm2 = vcmask (!%p280_p10), 64512  }
  0x16   : > { %s1797_s19 = scalar_select %p181_p11, %s1655_s26, %s183_s17  }
  0x17   : > { %283 = sbr.rel (%p280_p10) target bundleno = 3011 (0xbc3), region = 44  ;;  %1339 = vmatprep.subr.bf16.mxu0 (!%p280_p10), %v1677_v1  ;;  %1347 = vmatprep.subr.bf16.mxu1 (!%p280_p10), %v1677_v1  ;;  %p326_p12 = scmp.lt.s32.totalorder (!%p280_p10), %s1663_s28, 1  ;;  %v1261_v8 = vld [vmem:[%s2063_s3] ss:$0 sm:$0xff] (!%p280_p10)  ;;  %vm719_vm3 = vcmask (!%p280_p10), 130112   ;;  %vm863_vm4 = vcmask (!%p280_p10), 195712  }
  0x18   : > { %1343 = vmatprep.mubr.msk.bf16.mxu0 (!%p280_p10), %vm1678_vm0, %v1677_v1  ;;  %p328_p13 = scmp.lt.s32.totalorder (!%p280_p10), %s1810_s9, 3  ;;  %1351 = vmatprep.mubr.msk.bf16.mxu1 (!%p280_p10), %vm1678_vm0, %v1677_v1  ;;  %s1925_s20 = sand.u32 (!%p280_p10), 1, %s1651_s25   ;;  %vm1007_vm5 = vcmask (!%p280_p10), 261312  }
  0x19   : > { %s2069_s21 = sshll.u32 (!%p280_p10), %s1925_s20, 4 }
  0x1b   : > { %v1504_v0 = vld [vmem:[%s2076_s2] sm:$0xff] (!%p280_p10)   ;;  %v1505_v2 = vld [vmem:[%s2076_s2 + $0x8] sm:$0xff] (!%p280_p10)  }
  0x1c   : > { %1340 = vmatpush3.bf16.msra.mxu0 (!%p280_p10), %v1504_v0 }
  0x1d   : > { %1341 = vmatprep.subr.bf16.mxu0 (!%p280_p10), %v1677_v1 }
  0x1e   : > { %s327_s10 = scalar_select %p326_p12, %s1663_s28, 1 }
  0x1f   : > { %s329_s13 = scalar_select %p328_p13, %s1810_s9, 3 }
  0x20   : > { %1342 = vmatpush3.bf16.msra.mxu0 %v1505_v2  ;;  %s1257_s16 = sshll.u32 %s327_s10, 2  ;;  %s1308_s17 = sshll.u32 %s327_s10, 6 }
  0x21   : > { %s331_s18 = sadd.s32 %s1257_s16, %s329_s13  ;;  %s1822_s27 = scalar_lea.vmem %s2061_s1, %s1308_s17  ;;  %1355 = vmatprep.subr.bf16.mxu0 %v1677_v1 }
  0x22   : > { %s1258_s22 = sshll.u32 %s331_s18, 2  ;;  %v1507_v4 = vld [vmem:[%s1822_s27] sm:$0xff]   ;;  %v1508_v6 = vld [vmem:[%s1822_s27 + $0x8] sm:$0xff]   ;;  %s1679_s10 = smov 120   ;;  %v1509_v36 = vld [vmem:[%s1822_s27 + $0x10] sm:$0xff]  }
  0x23   : > { %s333_s12 = scalar_lea.vmem %s2060_s0, %s1258_s22  ;;  %v458_v5 = vsel %vm421_vm2, %v1507_v4, 0  ;;  %v461_v7 = vsel %vm421_vm2, %v1508_v6, 0  ;;  %v1510_v37 = vld [vmem:[%s1822_s27 + $0x18] sm:$0xff]   ;;  %v597_v45 = vsel %vm421_vm2, %v1509_v36, 0  ;;  %s1680_s13 = smov 112  }
  0x24   : > { %v1506_v3 = vld [vmem:[%s333_s12] sm:$0xff]   ;;  %1348 = vmatpush3.bf16.xpose.msra.mxu1 %v458_v5  ;;  %v600_v46 = vsel %vm421_vm2, %v1510_v37, 0  ;;  %s1681_s16 = smov 104   ;;  %s1682_s17 = smov 8  }
  0x25   : > { %1344 = vmatmul.mubr.msk.bf16.vlgmr.msra.gmra.mrb[0].mxu0 %vm373_vm1, %v1506_v3  ;;  %1349 = vmatprep.subr.bf16.mxu1 %v1677_v1  ;;  %s1683_s18 = smov 16  }
  0x26   : > { %1359 = vmatprep.mubr.msk.bf16.mxu0 %vm1678_vm0, %v1677_v1  ;;  %1356 = vmatpush3.bf16.msra.mxu0 %v1507_v4 }
  0x27   : > { %1357 = vmatprep.subr.bf16.mxu0 %v1677_v1 }
  0x2a   : > { %1358 = vmatpush3.bf16.msra.mxu0 %v1508_v6  ;;  %v1511_v6 = vld [vmem:[%s1822_s27 + $0x20] sm:$0xff]  }
  0x2b   : > { %1363 = vmatprep.subr.bf16.mxu0 %v1677_v1 }
  0x2c   : > { %1350 = vmatpush3.bf16.xpose.msra.mxu1 %v461_v7  ;;  %v1512_v7 = vld [vmem:[%s1822_s27 + $0x28] sm:$0xff]  }
  0x2d   : > { %1371 = vmatprep.subr.bf16.mxu1 %v1677_v1 }
  0xf8   : > { %v411_v9 = vpop.f32.mrb[0].mxu0 }
  0xf9   : > { %v412_v10 = vadd.f32 %v1261_v8, %v411_v9  ;;  %v1345_v11 = vpop.f32.mrb[1].mxu0 }
  0xfa   : > { %v414_v12 = vpop.f32.mrb[2].mxu0 }
  0xfb   : > { %v415_v13 = vadd.f32 %v1261_v8, %v414_v12  ;;  %v1346_v14 = vpop.f32.mrb[3].mxu0  ;;  %v418_v15 = vmul.f32 0.35355338, %v412_v10 }
  0xfd   : > { %v419_v16 = vmul.f32 0.35355338, %v415_v13 }
  0xff   : > { %v1842_v17 = vpack.c.bf16 %v419_v16, %v418_v15  ;;  %v741_v16 = vsel %vm421_vm2, %v1511_v6, 0 }
 0x101   : > { %422 = vst.msk [vmem:[#allocation2] sm:$0xff] %vm421_vm2, %v1842_v17 }
 0x108   : > { %v443_v18 = vld [vmem:[#allocation2] sm:$0xff] }
 0x109   : > { %1352 = vmatmul.mubr.msk.bf16.vlgmr.msra.gmra.mrb[0].mxu1 %vm421_vm2, %v443_v18  ;;  %v744_v18 = vsel %vm421_vm2, %v1512_v7, 0 }
 0x10a   : > { %1375 = vmatprep.mubr.msk.bf16.mxu1 %vm1678_vm0, %v1677_v1  ;;  %1372 = vmatpush3.bf16.msra.mxu1 %v1509_v36 }
 0x10b   : > { %1373 = vmatprep.subr.bf16.mxu1 %v1677_v1 }
 0x10e   : > { %1374 = vmatpush3.bf16.msra.mxu1 %v1510_v37 }
 0x10f   : > { %1379 = vmatprep.subr.bf16.mxu1 %v1677_v1 }
 0x1dc   : > { %v497_v19 = vpop.f32.mrb[0].mxu1 }
 0x1dd   : > { %v1353_v20 = vpop.f32.mrb[1].mxu1  ;;  %v504_v21 = vsel %vm373_vm1, %v497_v19, -inf }
 0x1de   : > { %505 = vmax.xlane.f32.xlu0 %v504_v21  ;;  %v500_v22 = vpop.f32.mrb[2].mxu1 }
 0x1df   : > { %v1354_v23 = vpop.f32.mrb[3].mxu1  ;;  %v507_v24 = vsel %vm373_vm1, %v500_v22, -inf }
 0x1e2   : > { %508 = vmax.xlane.f32.xlu0 %v507_v24 }
 0x1f8   : > { %424 = vrot.lane.b32.xlu0 %v1842_v17, %s1679_s10  ;;  %s1684_s10 = smov 24  }
 0x26b   : > { %v506_v25 = vpop.xlane.xlu0 %505 }
 0x26c   : > { %v510_v26 = vsub.f32 %v497_v19, %v506_v25 }
 0x26e   : > { %v512_v27 = vmul.f32 1.442695, %v510_v26 }
 0x26f   : > { %v509_v28 = vpop.xlane.xlu0 %508 }
 0x270   : > { %1517 = vpow2.f32 %v512_v27  ;;  %v511_v29 = vsub.f32 %v500_v22, %v509_v28 }
 0x272   : > { %v514_v30 = vmul.f32 1.442695, %v511_v29 }
 0x273   : > { %v425_v31 = vpop.permute.xlu0 %424 }
 0x274   : > { %1519 = vpow2.f32 %v514_v30  ;;  %428 = vst.msk [vmem:[#allocation2 + $0x8] sm:$0xff] %vm421_vm2, %v425_v31 }
 0x27a   : > { %v1518_v32 = vpop.eup %1517 }
 0x27b   : > { %v516_v33 = vsel %vm373_vm1, %v1518_v32, 0.0  ;;  %v582_v47 = vld [vmem:[#allocation2 + $0x8] sm:$0xff] }
 0x27c   : > { %517 = vadd.xlane.f32.xlu1 %v516_v33 }
 0x27e   : > { %v1520_v34 = vpop.eup %1519 }
 0x27f   : > { %v519_v35 = vsel %vm373_vm1, %v1520_v34, 0.0 }
 0x280   : > { %520 = vadd.xlane.f32.xlu1 %v519_v35 }
 0x309   : > { %v518_v38 = vpop.xlane.xlu1 %517 }
 0x30a   : > { %1521 = vrcp.f32 %v518_v38 }
 0x30d   : > { %v521_v39 = vpop.xlane.xlu1 %520 }
 0x30e   : > { %1523 = vrcp.f32 %v521_v39 }
 0x314   : > { %v1522_v40 = vpop.eup %1521 }
 0x315   : > { %v1859_v42 = vmul.f32 %v1522_v40, %v1518_v32 }
 0x318   : > { %v1524_v41 = vpop.eup %1523 }
 0x319   : > { %v1861_v43 = vmul.f32 %v1524_v41, %v1520_v34  ;;  %v1513_v41 = vld [vmem:[%s1822_s27 + $0x30] sm:$0xff]  }
 0x31b   : > { %v528_v44 = vpack.c.bf16 %v1861_v43, %v1859_v42 }
 0x31d   : > { %1360 = vmatmul.mubr.msk.bf16.vlgmr.msra.gmra.mrb[4].mxu0 %vm373_vm1, %v528_v44  ;;  %v1514_v44 = vld [vmem:[%s1822_s27 + $0x38] sm:$0xff]   ;;  %s1930_s27 = scalar_lea.vmem [#allocation6], %s2069_s21 }
 0x31e   : > { %1364 = vmatpush3.bf16.xpose.msra.mxu0 %v597_v45  ;;  %1367 = vmatprep.mubr.msk.bf16.mxu0 %vm1678_vm0, %v1677_v1 }
 0x31f   : > { %1365 = vmatprep.subr.bf16.mxu0 %v1677_v1 }
 0x326   : > { %1366 = vmatpush3.bf16.xpose.msra.mxu0 %v600_v46 }
 0x327   : > { %1387 = vmatprep.subr.bf16.mxu0 %v1677_v1 }
 0x32d   : > { %1368 = vmatmul.mubr.msk.bf16.vlgmr.msra.gmra.mrb[8].mxu0 %vm421_vm2, %v582_v47 }
 0x32e   : > { %1391 = vmatprep.mubr.msk.bf16.mxu0 %vm1678_vm0, %v1677_v1  ;;  %1388 = vmatpush3.bf16.msra.mxu0 %v1511_v6 }
 0x32f   : > { %1389 = vmatprep.subr.bf16.mxu0 %v1677_v1 }
 0x332   : > { %1390 = vmatpush3.bf16.msra.mxu0 %v1512_v7 }
 0x333   : > { %1395 = vmatprep.subr.bf16.mxu0 %v1677_v1 }
 0x3f0   : > { %v568_v48 = vpop.f32.mrb[4].mxu0 }
 0x3f1   : > { %v1361_v49 = vpop.f32.mrb[5].mxu0 }
 0x3f2   : > { %v571_v50 = vpop.f32.mrb[6].mxu0 }
 0x3f3   : > { %v575_v51 = vpack.c.bf16 %v571_v50, %v568_v48  ;;  %v1362_v52 = vpop.f32.mrb[7].mxu0 }
 0x3f5   : > { %576 = vst.msk [vmem:[#allocation3] sm:$0xff] %vm421_vm2, %v575_v51 }
 0x400   : > { %v636_v53 = vpop.f32.mrb[8].mxu0 }
 0x401   : > { %v1369_v54 = vpop.f32.mrb[9].mxu0  ;;  %v643_v55 = vsel %vm373_vm1, %v636_v53, -inf }
 0x402   : > { %644 = vmax.xlane.f32.xlu1 %v643_v55  ;;  %v639_v56 = vpop.f32.mrb[10].mxu0 }
 0x403   : > { %v1370_v57 = vpop.f32.mrb[11].mxu0  ;;  %v646_v58 = vsel %vm373_vm1, %v639_v56, -inf }
 0x404   : > { %v885_v57 = vsel %vm421_vm2, %v1513_v41, 0 }
 0x406   : > { %647 = vmax.xlane.f32.xlu1 %v646_v58 }
 0x48f   : > { %v645_v59 = vpop.xlane.xlu1 %644 }
 0x490   : > { %v649_v60 = vsub.f32 %v636_v53, %v645_v59 }
 0x492   : > { %v651_v61 = vmul.f32 1.442695, %v649_v60 }
 0x493   : > { %v648_v62 = vpop.xlane.xlu1 %647 }
 0x494   : > { %1525 = vpow2.f32 %v651_v61  ;;  %v650_v63 = vsub.f32 %v639_v56, %v648_v62 }
 0x496   : > { %v653_v0 = vmul.f32 1.442695, %v650_v63 }
 0x498   : > { %1527 = vpow2.f32 %v653_v0 }
 0x49e   : > { %v1526_v2 = vpop.eup %1525 }
 0x49f   : > { %v655_v3 = vsel %vm373_vm1, %v1526_v2, 0.0 }
 0x4a0   : > { %656 = vadd.xlane.f32.xlu1 %v655_v3 }
 0x4a2   : > { %v1528_v4 = vpop.eup %1527 }
 0x4a3   : > { %v658_v5 = vsel %vm373_vm1, %v1528_v4, 0.0 }
 0x4a4   : > { %659 = vadd.xlane.f32.xlu1 %v658_v5 }
 0x4b5   : > { %429 = vrot.lane.b32.xlu1 %v1842_v17, %s1680_s13  ;;  %s1301_s13 = sshll.u32 %s1663_s28, 2  ;;  %s1685_s28 = smov [#allocation6]  }
 0x52d   : > { %v657_v8 = vpop.xlane.xlu1 %656 }
 0x52e   : > { %1529 = vrcp.f32 %v657_v8 }
 0x531   : > { %v660_v9 = vpop.xlane.xlu1 %659 }
 0x532   : > { %1531 = vrcp.f32 %v660_v9 }
 0x535   : > { %v430_v10 = vpop.permute.xlu1 %429 }
 0x536   : > { %433 = vst.msk [vmem:[#allocation2 + $0x10] sm:$0xff] %vm421_vm2, %v430_v10 }
 0x538   : > { %v1530_v11 = vpop.eup %1529 }
 0x539   : > { %v663_v13 = vmul.f32 %v1530_v11, %v1526_v2 }
 0x53b   : > { %v665_v48 = vadd.f32 %v663_v13, %v1859_v42  ;;  %v888_v42 = vsel %vm421_vm2, %v1514_v44, 0 }
 0x53c   : > { %v1532_v12 = vpop.eup %1531 }
 0x53d   : > { %v1886_v14 = vmul.f32 %v1532_v12, %v1528_v4  ;;  %v726_v19 = vld [vmem:[#allocation2 + $0x10] sm:$0xff] }
 0x53f   : > { %v667_v15 = vpack.c.bf16 %v1886_v14, %v663_v13  ;;  %v666_v53 = vadd.f32 %v1886_v14, %v1861_v43 }
 0x541   : > { %1376 = vmatmul.mubr.msk.bf16.vlgmr.msra.gmra.mrb[4].mxu1 %vm373_vm1, %v667_v15 }
 0x542   : > { %1380 = vmatpush3.bf16.xpose.msra.mxu1 %v741_v16  ;;  %1383 = vmatprep.mubr.msk.bf16.mxu1 %vm1678_vm0, %v1677_v1 }
 0x543   : > { %1381 = vmatprep.subr.bf16.mxu1 %v1677_v1 }
 0x54a   : > { %1382 = vmatpush3.bf16.xpose.msra.mxu1 %v744_v18 }
 0x54b   : > { %1403 = vmatprep.subr.bf16.mxu1 %v1677_v1 }
 0x551   : > { %1384 = vmatmul.mubr.msk.bf16.vlgmr.msra.gmra.mrb[8].mxu1 %vm421_vm2, %v726_v19 }
 0x552   : > { %1407 = vmatprep.mubr.msk.bf16.mxu1 %vm1678_vm0, %v1677_v1  ;;  %1404 = vmatpush3.bf16.msra.mxu1 %v1513_v41 }
 0x553   : > { %1405 = vmatprep.subr.bf16.mxu1 %v1677_v1 }
 0x556   : > { %1406 = vmatpush3.bf16.msra.mxu1 %v1514_v44 }
 0x557   : > { %1411 = vmatprep.subr.bf16.mxu1 %v1677_v1 }
 0x614   : > { %v707_v20 = vpop.f32.mrb[4].mxu1 }
 0x615   : > { %v1377_v21 = vpop.f32.mrb[5].mxu1 }
 0x616   : > { %v710_v22 = vpop.f32.mrb[6].mxu1 }
 0x617   : > { %v714_v23 = vpack.c.bf16 %v710_v22, %v707_v20  ;;  %v1378_v24 = vpop.f32.mrb[7].mxu1 }
 0x624   : > { %v780_v25 = vpop.f32.mrb[8].mxu1 }
 0x625   : > { %v1385_v26 = vpop.f32.mrb[9].mxu1  ;;  %v787_v27 = vsel %vm373_vm1, %v780_v25, -inf }
 0x626   : > { %788 = vmax.xlane.f32.xlu0 %v787_v27  ;;  %v783_v28 = vpop.f32.mrb[10].mxu1  ;;  %v1515_v27 = vld [vmem:[%s2064_s4] sm:$0xff]  }
 0x627   : > { %v1386_v29 = vpop.f32.mrb[11].mxu1  ;;  %v790_v30 = vsel %vm373_vm1, %v783_v28, -inf }
 0x628   : > { %791 = vmax.xlane.f32.xlu1 %v790_v30 }
 0x6b3   : > { %v789_v31 = vpop.xlane.xlu0 %788 }
 0x6b4   : > { %v793_v32 = vsub.f32 %v780_v25, %v789_v31 }
 0x6b5   : > { %v792_v33 = vpop.xlane.xlu1 %791 }
 0x6b6   : > { %v795_v34 = vmul.f32 1.442695, %v793_v32  ;;  %v794_v35 = vsub.f32 %v783_v28, %v792_v33  ;;  %v1516_v28 = vld [vmem:[%s2064_s4 + $0x8] sm:$0xff]  }
 0x6b8   : > { %1533 = vpow2.f32 %v795_v34  ;;  %v797_v36 = vmul.f32 1.442695, %v794_v35 }
 0x6ba   : > { %1535 = vpow2.f32 %v797_v36 }
 0x6c2   : > { %v1534_v37 = vpop.eup %1533 }
 0x6c3   : > { %v799_v38 = vsel %vm373_vm1, %v1534_v37, 0.0 }
 0x6c4   : > { %v1536_v39 = vpop.eup %1535  ;;  %800 = vadd.xlane.f32.xlu0 %v799_v38 }
 0x6c5   : > { %v802_v40 = vsel %vm373_vm1, %v1536_v39, 0.0 }
 0x6c8   : > { %803 = vadd.xlane.f32.xlu0 %v802_v40 }
 0x6de   : > { %434 = vrot.lane.b32.xlu0 %v1842_v17, %s1681_s16  ;;  %s1949_s16 = sadd.s32 %s1301_s13, %s1810_s9  ;;  %s1553_s9 = sshll.u32 %s1685_s28, 4  ;;  %s1554_s9 = int_to_ptr.vmem [resolvable:$false] %s1553_s9 }
 0x6df   : > { %s2070_s22 = sshll.u32 %s1949_s16, 7 }
 0x6e0   : > { %s1958_s12 = scalar_lea.hbm %s2067_s7, %s2070_s22 }
 0x6e2   : > { %716 = vrot.lane.b32.xlu0 %v714_v23, %s1682_s17 }
 0x751   : > { %v801_v45 = vpop.xlane.xlu0 %800 }
 0x752   : > { %1537 = vrcp.f32 %v801_v45 }
 0x755   : > { %v804_v46 = vpop.xlane.xlu0 %803 }
 0x756   : > { %1539 = vrcp.f32 %v804_v46 }
 0x759   : > { %v435_v47 = vpop.permute.xlu0 %434 }
 0x75a   : > { %438 = vst.msk [vmem:[#allocation2 + $0x18] sm:$0xff] %vm421_vm2, %v435_v47 }
 0x75c   : > { %v1538_v17 = vpop.eup %1537 }
 0x75d   : > { %v807_v49 = vmul.f32 %v1538_v17, %v1534_v37  ;;  %v717_v50 = vpop.permute.xlu0 %716 }
 0x75e   : > { %720 = vst.msk [vmem:[#allocation3] sm:$0xff] %vm719_vm3, %v717_v50 }
 0x75f   : > { %v809_v51 = vadd.f32 %v807_v49, %v665_v48 }
 0x760   : > { %v1540_v52 = vpop.eup %1539 }
 0x761   : > { %v808_v54 = vmul.f32 %v1540_v52, %v1536_v39  ;;  %v870_v58 = vld [vmem:[#allocation2 + $0x18] sm:$0xff] }
 0x763   : > { %v810_v55 = vadd.f32 %v808_v54, %v666_v53  ;;  %v811_v56 = vpack.c.bf16 %v808_v54, %v807_v49 }
 0x765   : > { %1392 = vmatmul.mubr.msk.bf16.vlgmr.msra.gmra.mrb[12].mxu0 %vm373_vm1, %v811_v56 }
 0x766   : > { %1396 = vmatpush3.bf16.xpose.msra.mxu0 %v885_v57  ;;  %1399 = vmatprep.mubr.msk.bf16.mxu0 %vm1678_vm0, %v1677_v1 }
 0x767   : > { %1397 = vmatprep.subr.bf16.mxu0 %v1677_v1 }
 0x76e   : > { %1398 = vmatpush3.bf16.xpose.msra.mxu0 %v888_v42 }
 0x775   : > { %1400 = vmatmul.mubr.msk.bf16.vlgmr.msra.gmra.mrb[16].mxu0 %vm421_vm2, %v870_v58 }
 0x838   : > { %v851_v43 = vpop.f32.mrb[12].mxu0 }
 0x839   : > { %v1393_v59 = vpop.f32.mrb[13].mxu0 }
 0x83a   : > { %v854_v60 = vpop.f32.mrb[14].mxu0 }
 0x83b   : > { %v858_v61 = vpack.c.bf16 %v854_v60, %v851_v43  ;;  %v1394_v62 = vpop.f32.mrb[15].mxu0 }
 0x848   : > { %v924_v63 = vpop.f32.mrb[16].mxu0 }
 0x849   : > { %v1401_v0 = vpop.f32.mrb[17].mxu0  ;;  %v931_v2 = vsel %vm373_vm1, %v924_v63, -inf }
 0x84a   : > { %932 = vmax.xlane.f32.xlu1 %v931_v2  ;;  %v927_v3 = vpop.f32.mrb[18].mxu0 }
 0x84b   : > { %v1402_v4 = vpop.f32.mrb[19].mxu0  ;;  %v934_v5 = vsel %vm373_vm1, %v927_v3, -inf }
 0x84e   : > { %935 = vmax.xlane.f32.xlu1 %v934_v5 }
 0x8d7   : > { %v933_v6 = vpop.xlane.xlu1 %932 }
 0x8d8   : > { %v937_v7 = vsub.f32 %v924_v63, %v933_v6 }
 0x8da   : > { %v939_v8 = vmul.f32 1.442695, %v937_v7 }
 0x8db   : > { %v936_v9 = vpop.xlane.xlu1 %935 }
 0x8dc   : > { %1541 = vpow2.f32 %v939_v8  ;;  %v938_v10 = vsub.f32 %v927_v3, %v936_v9 }
 0x8de   : > { %v941_v11 = vmul.f32 1.442695, %v938_v10 }
 0x8e0   : > { %1543 = vpow2.f32 %v941_v11 }
 0x8e6   : > { %v1542_v12 = vpop.eup %1541 }
 0x8e7   : > { %v943_v13 = vsel %vm373_vm1, %v1542_v12, 0.0 }
 0x8e8   : > { %944 = vadd.xlane.f32.xlu1 %v943_v13 }
 0x8ea   : > { %v1544_v14 = vpop.eup %1543 }
 0x8eb   : > { %v946_v15 = vsel %vm373_vm1, %v1544_v14, 0.0 }
 0x8ec   : > { %947 = vadd.xlane.f32.xlu1 %v946_v15 }
 0x8fd   : > { %860 = vrot.lane.b32.xlu1 %v858_v61, %s1683_s18  ;;  %s1120_s18 = sshll.u32 %s1930_s27, 4  ;;  %s1960_s18 = int_to_ptr.vmem [resolvable:$true] %s1120_s18 }
 0x8fe   : > { %s1549_s21 = scalar_lea.vmem %s1960_s18, 256  ;;  %p1556_p4 = scmp.lt.s32.totalorder %s1960_s18, %s1554_s9 }
 0x8ff   : > { %p1550_p0 = scmp.ne.s32.totalorder %s1960_s18, %s1549_s21 }
 0x901   : > { %p1551_p1 = pnand %p1550_p0, %p1779_p3 }
 0x903   : > { %p1552_p2 = pneg %p1551_p1 }
 0x975   : > { %v945_v16 = vpop.xlane.xlu1 %944 }
 0x976   : > { %1545 = vrcp.f32 %v945_v16 }
 0x979   : > { %v948_v18 = vpop.xlane.xlu1 %947 }
 0x97a   : > { %1547 = vrcp.f32 %v948_v18 }
 0x97d   : > { %v861_v19 = vpop.permute.xlu1 %860 }
 0x97e   : > { %864 = vst.msk [vmem:[#allocation3] sm:$0xff] %vm863_vm4, %v861_v19 }
 0x980   : > { %v1546_v20 = vpop.eup %1545 }
 0x981   : > { %v951_v21 = vmul.f32 %v1546_v20, %v1542_v12 }
 0x983   : > { %v953_v22 = vadd.f32 %v951_v21, %v809_v51 }
 0x984   : > { %v1548_v23 = vpop.eup %1547 }
 0x985   : > { %v952_v24 = vmul.f32 %v1548_v23, %v1544_v14  ;;  %1079 = vst.msk [vmem:[%s1930_s27] sm:$0xff] %vm373_vm1, %v953_v22 }
 0x987   : > { %v954_v25 = vadd.f32 %v952_v24, %v810_v55  ;;  %v955_v26 = vpack.c.bf16 %v952_v24, %v951_v21 }
 0x989   : > { %1408 = vmatmul.mubr.msk.bf16.vlgmr.msra.gmra.mrb[12].mxu1 %vm373_vm1, %v955_v26  ;;  %1080 = vst.msk [vmem:[%s1930_s27 + $0x8] sm:$0xff] %vm373_vm1, %v954_v25  ;;  %s1555_s27 = scalar_lea.vmem %s1554_s9, 512 }
 0x98a   : > { %1415 = vmatprep.mubr.msk.bf16.mxu1 %vm1678_vm0, %v1677_v1  ;;  %1412 = vmatpush3.bf16.msra.mxu1 %v1515_v27  ;;  %p1557_p5 = scmp.lt.s32.totalorder %s1555_s27, %s1549_s21 }
 0x98b   : > { %1413 = vmatprep.subr.bf16.mxu1 %v1677_v1 }
 0x98c   : > { %p1558_p6 = por %p1557_p5, %p1556_p4 }
 0x98e   : > { %1414 = vmatpush3.bf16.msra.mxu1 %v1516_v28  ;;  %p1559_p7 = pnand %p1558_p6, %p1552_p2 }
 0xa5c   : > { %v995_v29 = vpop.f32.mrb[12].mxu1 }
 0xa5d   : > { %v1409_v30 = vpop.f32.mrb[13].mxu1 }
 0xa5e   : > { %v998_v31 = vpop.f32.mrb[14].mxu1 }
 0xa5f   : > { %v1002_v32 = vpack.c.bf16 %v998_v31, %v995_v29  ;;  %v1410_v33 = vpop.f32.mrb[15].mxu1 }
 0xa61   : > { %1004 = vrot.lane.b32.xlu0 %v1002_v32, %s1684_s10  ;;  %s1087_s10 = scalar_lea.sflag [#allocation7], %s1925_s20 }
 0xad3   : > { %v1005_v34 = vpop.permute.xlu0 %1004 }
 0xad4   : > { %1008 = vst.msk [vmem:[#allocation3] sm:$0xff] %vm1007_vm5, %v1005_v34 }
 0xadb   : > { %v1009_v35 = vld [vmem:[#allocation3] sm:$0xff] }
 0xadc   : > { %1416 = vmatmul.mubr.msk.bf16.vlgmr.msra.gmra.mrb[16].mxu1 %vm373_vm1, %v1009_v35 }
 0xadd   : > { %1562 = shalt.err (!%p1559_p7)
}
 0xade   : > { %s1563_s13 = scalar_lea.hbm %s1958_s12, 256  ;;  %s1567_s28 = scalar_lea.hbm %s2067_s7, 1024 }
 0xadf   : > { %p1564_p9 = scmp.ne.s32.totalorder %s1958_s12, %s1563_s13  ;;  %p1568_p12 = scmp.lt.u32.totalorder %s1958_s12, %s2067_s7 }
 0xae0   : > { %p1569_p13 = scmp.lt.u32.totalorder %s1567_s28, %s1563_s13  ;;  %p1571_p1 = scmp.lt.u32.totalorder %s1563_s13, %s1958_s12 }
 0xae1   : > { %p1565_p10 = pnand %p1564_p9, %p1779_p3 }
 0xae2   : > { %p1570_p0 = por %p1569_p13, %p1568_p12 }
 0xae3   : > { %p1566_p11 = pneg %p1565_p10 }
 0xae4   : > { %p1572_p2 = por %p1571_p1, %p1570_p0 }
 0xae6   : > { %p1573_p4 = pnand %p1572_p2, %p1566_p11 }
 0xae8   : > { %1576 = shalt.err (!%p1573_p4)
}
 0xae9   : > { %s2071_s21 = smov 128   ;;  %v1294_v1 = vld [vmem:[%s2065_s5] ss:$0 sm:$0xff]  ;;  %s2077_s13 = sshll.u32 %s1925_s20, 4 }
 0xaea   : > { %1420 = dma.vmem_to_hbm [thread:$0]  (%p1779_p3), %s1960_s18, 256, %s1958_s12, %s1087_s10, %s2071_s21, %s2071_s21, %s1682_s17  }
 0xaeb   : > { %s317_s23 = scalar_lea.vmem [#allocation4], %s2077_s13  ;;  %s2078_s18 = sshll.u32 %s1949_s16, 7 }
 0xaec   : > { %s1102_s2 = sshll.u32 %s317_s23, 4  ;;  %s2002_s28 = scalar_lea.hbm %s2066_s6, %s2078_s18  ;;  %s1994_s2 = int_to_ptr.vmem [resolvable:$true] %s1102_s2 }
 0xaed   : > { %s1082_s9 = scalar_lea.sflag [#allocation5], %s1925_s20  ;;  %s1577_s22 = scalar_lea.vmem %s1994_s2, 256 }
 0xaee   : > { %p1578_p5 = scmp.ne.s32.totalorder %s1994_s2, %s1577_s22  ;;  %s1687_s27 = smov [#allocation4]  }
 0xaef   : > { %s1581_s13 = sshll.u32 %s1687_s27, 4  ;;  %s1582_s13 = int_to_ptr.vmem [resolvable:$false] %s1581_s13 }
 0xaf0   : > { %p1579_p6 = pnand %p1578_p5, %p1779_p3  ;;  %s1583_s21 = scalar_lea.vmem %s1582_s13, 512 }
 0xaf1   : > { %p1584_p9 = scmp.lt.s32.totalorder %s1994_s2, %s1582_s13  ;;  %p1585_p10 = scmp.lt.s32.totalorder %s1583_s21, %s1577_s22 }
 0xaf2   : > { %p1580_p7 = pneg %p1579_p6 }
 0xaf3   : > { %p1586_p11 = por %p1585_p10, %p1584_p9 }
 0xaf5   : > { %p1587_p12 = pnand %p1586_p11, %p1580_p7 }
 0xbaf   : > { %v1070_v36 = vpop.f32.mrb[16].mxu1 }
 0xbb0   : > { %v1071_v37 = vadd.f32 %v1294_v1, %v1070_v36  ;;  %v1417_v38 = vpop.f32.mrb[17].mxu1 }
 0xbb1   : > { %v1073_v39 = vpop.f32.mrb[18].mxu1 }
 0xbb2   : > { %1077 = vst.msk [vmem:[%s317_s23] sm:$0xff] %vm373_vm1, %v1071_v37  ;;  %v1074_v40 = vadd.f32 %v1294_v1, %v1073_v39  ;;  %v1418_v41 = vpop.f32.mrb[19].mxu1 }
 0xbb4   : > { %1078 = vst.msk [vmem:[%s317_s23 + $0x8] sm:$0xff] %vm373_vm1, %v1074_v40 }
 0xbb5   : > { %1590 = shalt.err (!%p1587_p12)
}
 0xbb6   : > { %s1591_s16 = scalar_lea.hbm %s2002_s28, 256  ;;  %s1595_s12 = scalar_lea.hbm %s2066_s6, 1024 }
 0xbb7   : > { %p1592_p13 = scmp.ne.s32.totalorder %s2002_s28, %s1591_s16  ;;  %p1596_p2 = scmp.lt.u32.totalorder %s2002_s28, %s2066_s6 }
 0xbb8   : > { %p1597_p4 = scmp.lt.u32.totalorder %s1595_s12, %s1591_s16  ;;  %p1599_p6 = scmp.lt.u32.totalorder %s1591_s16, %s2002_s28 }
 0xbb9   : > { %p1593_p0 = pnand %p1592_p13, %p1779_p3 }
 0xbba   : > { %p1598_p5 = por %p1597_p4, %p1596_p2 }
 0xbbb   : > { %p1594_p1 = pneg %p1593_p0 }
 0xbbc   : > { %p1600_p7 = por %p1599_p6, %p1598_p5 }
 0xbbe   : > { %p1601_p9 = pnand %p1600_p7, %p1594_p1 }
 0xbc0   : > { %1604 = shalt.err (!%p1601_p9)
}
 0xbc1   : > { %s2079_s21 = smov 128  }
 0xbc2   : > { %1419 = dma.vmem_to_hbm [thread:$0]  (%p1779_p3), %s1994_s2, 256, %s2002_s28, %s1082_s9, %s2079_s21, %s2079_s21, %s1682_s17  }
 0xbc3 PF: > { %p1430_p10 = scmp.ge.s32.totalorder %s1675_s8, 2  ;;  %s1135_s22 = sand.u32 1, %s1647_s24  }
 0xbc4   : > { %s1136_s13 = scalar_lea.sflag [#allocation5], %s1135_s22 }
 0xbc5   : > { %p1424_p11 = pnand %p1430_p10, %p1788_p8 }
 0xbc7   : > { %1638 = dma.done.wait (!%p1424_p11), %s1136_s13, 256  }
 0xbc8   : > { %1640 = vsyncadd (!%p1424_p11), %s1136_s13, 4294967040  ;;  %s1145_s14 = scalar_lea.sflag [#allocation7], %s1135_s22 }
 0xbc9   : > { %1642 = dma.done.wait (!%p1424_p11), %s1145_s14, 256  }
 0xbca   : > { %1644 = vsyncadd (!%p1424_p11), %s1145_s14, 4294967040  ;;  %s24_s8 = sadd.s32 1, %s1675_s8   ;;  %s2080_s17 = sld [smem:[#allocation10_spill]] }
 0xbcb   : > { %p21_p12 = scmp.ge.s32.totalorder %s24_s8, 6   ;;  %s2081_s24 = smov %s1651_s25 }
 0xbcc   : > { %s2082_s25 = smov %s1655_s26  ;;  %s2083_s26 = smov %s1797_s19 }
 0xbcd   : > { %s2084_s27 = smov %s1667_s29  ;;  %s2085_s28 = smov %s1671_s30 }
 0xbce   : > { %s2086_s29 = smov %s2089_s11  ;;  %23 = sbr.rel (!%p21_p12) target bundleno = 9 (0x9), region = 105 }
 0xbd0   : > { %s2087_s30 = smov %s2080_s17 }
 0xbd5   :  { %1150 = vsyncpa [#allocation5], 1 }
 0xbd6   :  { %1152 = vsyncpa [#allocation5 + $0x1], 1 }
 0xbd7   :  { %1153 = vsyncpa [#allocation7], 1 }
 0xbd8   :  { %1155 = vsyncpa [#allocation7 + $0x1], 1 }

</bundles_post_ra>
